<compile_context>
chip_gen: v6e
topology: v6e:2x2x1
jax: 0.10.0
libtpu: 0.0.40
codegen_flags: <defaults>
</compile_context>

<pallas_src>
import math

import jax
import jax.numpy as jnp
from jax.experimental import pallas as pl
from jax.experimental.pallas import tpu as pltpu

hidden_size = 64
num_inputs = 15
num_outputs = 4

_FUSED = 2 * hidden_size        # 128 fused hidden width (critic | actor)
_K_PAD = 16                     # contraction dim padded to 2 sublane groups
_B1_ROW = 16                    # row of fused layer-1 bias inside p1
_B2_ROW = 17                    # row of fused layer-2 bias inside p1
_P1_ROWS = 24                   # p1 padded to a multiple of 8 sublanes
_OUT_W = 8                      # narrow output slab: [value | probs(4) | pad(3)]


def _round_up(n, m):
    return ((n + m - 1) // m) * m


def _actor_critic_kernel(x_ref, p1_ref, w2_ref, out_ref):
    """x:(bb,16)  p1:(24,128)  w2:(128,128)  out:(bb,8)=[value|probs|pad]."""
    x = x_ref[...].astype(jnp.float32)

    w1 = p1_ref[0:_K_PAD, :]                # (16, 128)  [wc1 | wa1] + zero guard row
    b1 = p1_ref[_B1_ROW:_B1_ROW + 1, :]     # (1, 128)   [bc1 | ba1]
    b2 = p1_ref[_B2_ROW:_B2_ROW + 1, :]     # (1, 128)   [bc2 | ba2 | 0...]

    # Fused layer 1 for both branches: one 128-wide MXU push.
    h = jnp.dot(x, w1, preferred_element_type=jnp.float32) + b1
    h = jnp.maximum(h, 0.0)                 # (bb, 128) = [hc | ha]

    # Fused layer 2 (block-diagonal W2): one MXU push.
    # lane 0 -> critic value, lanes 1..4 -> actor logits, rest -> 0.
    out = jnp.dot(h, w2_ref[...], preferred_element_type=jnp.float32) + b2

    # Lane masks built once at (1,128) (single vreg), broadcast over rows.
    lane = jax.lax.broadcasted_iota(jnp.int32, (1, _FUSED), 1)
    is_logit = jnp.logical_and(lane >= 1, lane < 1 + num_outputs)

    # Numerically stable, EXACT softmax over the logit lanes only (torch dim=1).
    masked_logits = jnp.where(is_logit, out, -jnp.inf)     # mask BEFORE exp
    m = jnp.max(masked_logits, axis=-1, keepdims=True)
    e = jnp.exp(masked_logits - m)                          # exp(-inf) -> 0
    denom = jnp.sum(e, axis=-1, keepdims=True)
    probs = e / denom                                       # exact normalization

    # Lane 0 keeps the critic value; lanes 1..4 get probs; lanes 5..7 are 0.
    result = jnp.where(lane == 0, out, probs)               # (bb, 128)
    out_ref[...] = result[:, 0:_OUT_W].astype(out_ref.dtype)


def actor_critic_forward(x, packed, *, batch_block=2048):
    """Fused ActorCritic forward.

    x:      (B, num_inputs) float32
    packed: dict from pack_params()
    returns (probs (B, num_outputs), value (B, 1))
    """
    B = x.shape[0]
    # Tile: full (8-rounded) batch when small, otherwise fixed batch_block
    # with real tail padding (never bb = B for large ragged batches).
    bb = min(batch_block, _round_up(B, 8))
    num_blocks = pl.cdiv(B, bb)
    B_pad = num_blocks * bb
    grid = (num_blocks,)

    # Pad the batch (tail handling) and the contraction dim to K=16.
    x_pad = jnp.zeros((B_pad, _K_PAD), jnp.float32)
    x_pad = x_pad.at[:B, :num_inputs].set(x.astype(jnp.float32))

    param_bytes = (_P1_ROWS * _FUSED + _FUSED * _FUSED) * 4
    cost = pl.CostEstimate(
        flops=2 * B_pad * _K_PAD * _FUSED + 2 * B_pad * _FUSED * _FUSED,
        transcendentals=B_pad * _FUSED,
        bytes_accessed=B_pad * (_K_PAD + _OUT_W) * 4 + param_bytes,
    )

    slab = pl.pallas_call(
        _actor_critic_kernel,
        out_shape=jax.ShapeDtypeStruct((B_pad, _OUT_W), jnp.float32),
        grid_spec=pltpu.PrefetchScalarGridSpec(
            num_scalar_prefetch=0,
            grid=grid,
            in_specs=[
                pl.BlockSpec((bb, _K_PAD), lambda i: (i, 0)),
                pl.BlockSpec((_P1_ROWS, _FUSED), lambda i: (0, 0)),
                pl.BlockSpec((_FUSED, _FUSED), lambda i: (0, 0)),
            ],
            out_specs=pl.BlockSpec((bb, _OUT_W), lambda i: (i, 0)),
        ),
        compiler_params=pltpu.CompilerParams(
            dimension_semantics=("parallel",)),
        cost_estimate=cost,
    )(x_pad, packed["p1"], packed["w2"])

    value = slab[:B, 0:1]
    probs = slab[:B, 1:1 + num_outputs]
    return probs, value


def init_params(key):
    """PyTorch-style uniform(+/- 1/sqrt(fan_in)) init, per-layer layout."""
    keys = jax.random.split(key, 8)

    def linear(kw, kb, fan_in, fan_out):
        bound = 1.0 / math.sqrt(fan_in)
        w = jax.random.uniform(kw, (fan_in, fan_out), jnp.float32, -bound, bound)
        b = jax.random.uniform(kb, (fan_out,), jnp.float32, -bound, bound)
        return w, b

    wc1, bc1 = linear(keys[0], keys[1], num_inputs, hidden_size)
    wc2, bc2 = linear(keys[2], keys[3], hidden_size, 1)
    wa1, ba1 = linear(keys[4], keys[5], num_inputs, hidden_size)
    wa2, ba2 = linear(keys[6], keys[7], hidden_size, num_outputs)
    return {
        "wc1": wc1, "bc1": bc1, "wc2": wc2, "bc2": bc2,
        "wa1": wa1, "ba1": ba1, "wa2": wa2, "ba2": ba2,
    }


def pack_params(raw):
    """Pack per-layer params into the fused, lane-dense kernel layout.

    p1 (24, 128): rows 0-14 = [wc1|wa1], row 15 = 0 (K=16 padding guard),
                  row 16 = [bc1|ba1], row 17 = fused layer-2 bias, rest 0.
    w2 (128,128): block-diagonal second layer (col 0 = critic, cols 1-4 = actor).
    """
    W1 = jnp.concatenate([raw["wc1"], raw["wa1"]], axis=1)       # (15, 128)
    b1 = jnp.concatenate([raw["bc1"], raw["ba1"]])               # (128,)
    b2 = jnp.zeros((_FUSED,), jnp.float32)
    b2 = b2.at[0].set(raw["bc2"][0])
    b2 = b2.at[1:1 + num_outputs].set(raw["ba2"])

    p1 = jnp.zeros((_P1_ROWS, _FUSED), jnp.float32)
    p1 = p1.at[:num_inputs, :].set(W1)
    p1 = p1.at[_B1_ROW, :].set(b1)
    p1 = p1.at[_B2_ROW, :].set(b2)

    W2 = jnp.zeros((_FUSED, _FUSED), jnp.float32)
    W2 = W2.at[:hidden_size, 0].set(raw["wc2"][:, 0])
    W2 = W2.at[hidden_size:, 1:1 + num_outputs].set(raw["wa2"])
    return {"p1": p1, "w2": W2}


def _reference(x, p):
    """Pure-JAX reference (unfused, from the raw per-layer params)."""
    hc = jnp.maximum(x @ p["wc1"] + p["bc1"], 0.0)
    value = hc @ p["wc2"] + p["bc2"]
    ha = jnp.maximum(x @ p["wa1"] + p["ba1"], 0.0)
    logits = ha @ p["wa2"] + p["ba2"]
    probs = jax.nn.softmax(logits, axis=1)
    return probs, value


if __name__ == "__main__":
    key = jax.random.PRNGKey(0)
    k_param, k_x = jax.random.split(key)

    raw = init_params(k_param)
    packed = pack_params(raw)

    # --- Small per-env-step batch (overhead-bound path, single grid step) ---
    B = 8
    x = jax.random.normal(k_x, (B, num_inputs), dtype=jnp.float32)

    probs, value = actor_critic_forward(x, packed)
    probs = jax.block_until_ready(probs)
    value = jax.block_until_ready(value)

    ref_probs, ref_value = _reference(x, raw)
    assert probs.shape == (B, num_outputs)
    assert value.shape == (B, 1)
    assert jnp.allclose(value, ref_value, atol=1e-5, rtol=1e-5)
    assert jnp.allclose(probs, ref_probs, atol=1e-5, rtol=1e-5)
    # rows of probs must sum to ~1 (valid Categorical parameters) -- exact softmax
    assert jnp.allclose(jnp.sum(probs, axis=1), 1.0, atol=1e-5)

    # --- Ragged batch with a small tile: exercises cdiv grid + tail padding ---
    B2 = 20
    x2 = jax.random.normal(jax.random.PRNGKey(1), (B2, num_inputs), dtype=jnp.float32)
    probs2, value2 = actor_critic_forward(x2, packed, batch_block=8)
    probs2 = jax.block_until_ready(probs2)
    value2 = jax.block_until_ready(value2)

    ref_probs2, ref_value2 = _reference(x2, raw)
    assert probs2.shape == (B2, num_outputs)
    assert value2.shape == (B2, 1)
    assert jnp.allclose(value2, ref_value2, atol=1e-5, rtol=1e-5)
    assert jnp.allclose(probs2, ref_probs2, atol=1e-5, rtol=1e-5)
    assert jnp.allclose(jnp.sum(probs2, axis=1), 1.0, atol=1e-5)

    print("KERNEL_OK")
</pallas_src>

<mosaic_0001>
module attributes {stable_mosaic.version = 11 : i64} {
  func.func @_actor_critic_kernel(%arg0: i32, %arg1: memref<8x16xf32, #tpu.memory_space<vmem>>, %arg2: memref<24x128xf32, #tpu.memory_space<vmem>>, %arg3: memref<128x128xf32, #tpu.memory_space<vmem>>, %arg4: memref<8x8xf32, #tpu.memory_space<vmem>>) attributes {dimension_semantics = [#tpu.dimension_semantics<parallel>], iteration_bounds = array<i64: 1>, scalar_prefetch = 0 : i64, scratch_operands = 0 : i64, tpu.core_type = #tpu.core_type<tc>, window_params = [{transform_indices = @transform_0, window_bounds = array<i64: 8, 16>}, {pipeline_mode = #tpu.pipeline_mode<synchronous>, transform_indices = @transform_1, window_bounds = array<i64: 24, 128>}, {pipeline_mode = #tpu.pipeline_mode<synchronous>, transform_indices = @transform_2, window_bounds = array<i64: 128, 128>}, {transform_indices = @transform_3, window_bounds = array<i64: 8, 8>}]} {
    %c0 = arith.constant 0 : index
    %c0_0 = arith.constant 0 : index
    %0 = vector.load %arg1[%c0, %c0_0] : memref<8x16xf32, #tpu.memory_space<vmem>>, vector<8x16xf32>
    %c0_1 = arith.constant 0 : index
    %c0_2 = arith.constant 0 : index
    %1 = vector.load %arg2[%c0_1, %c0_2] : memref<24x128xf32, #tpu.memory_space<vmem>>, vector<16x128xf32>
    %c16 = arith.constant 16 : index
    %c0_3 = arith.constant 0 : index
    %2 = vector.load %arg2[%c16, %c0_3] : memref<24x128xf32, #tpu.memory_space<vmem>>, vector<1x128xf32>
    %c17 = arith.constant 17 : index
    %c0_4 = arith.constant 0 : index
    %3 = vector.load %arg2[%c17, %c0_4] : memref<24x128xf32, #tpu.memory_space<vmem>>, vector<1x128xf32>
    %cst = arith.constant dense<0.000000e+00> : vector<8x128xf32>
    %4 = tpu.matmul %0, %1, %cst {dimension_numbers = #tpu.dot_dimension_numbers<[1], [0], [0], [1], [0, 0, 1, 1], [], []>} : vector<8x16xf32>, vector<16x128xf32>, vector<8x128xf32> -> vector<8x128xf32>
    %5 = vector.broadcast %2 : vector<1x128xf32> to vector<8x128xf32>
    %6 = arith.addf %4, %5 : vector<8x128xf32>
    %cst_5 = arith.constant 0.000000e+00 : f32
    %7 = vector.broadcast %cst_5 : f32 to vector<8x128xf32>
    %8 = arith.maximumf %6, %7 : vector<8x128xf32>
    %c0_6 = arith.constant 0 : index
    %c0_7 = arith.constant 0 : index
    %9 = vector.load %arg3[%c0_6, %c0_7] : memref<128x128xf32, #tpu.memory_space<vmem>>, vector<128x128xf32>
    %cst_8 = arith.constant dense<0.000000e+00> : vector<8x128xf32>
    %10 = tpu.matmul %8, %9, %cst_8 {dimension_numbers = #tpu.dot_dimension_numbers<[1], [0], [0], [1], [0, 0, 1, 1], [], []>} : vector<8x128xf32>, vector<128x128xf32>, vector<8x128xf32> -> vector<8x128xf32>
    %11 = vector.broadcast %3 : vector<1x128xf32> to vector<8x128xf32>
    %12 = arith.addf %10, %11 : vector<8x128xf32>
    %13 = tpu.iota {dimensions = array<i32: 1>} : vector<1x128xi32>
    %c1_i32 = arith.constant 1 : i32
    %14 = vector.broadcast %c1_i32 : i32 to vector<1x128xi32>
    %15 = arith.cmpi sge, %13, %14 : vector<1x128xi32>
    %c5_i32 = arith.constant 5 : i32
    %16 = vector.broadcast %c5_i32 : i32 to vector<1x128xi32>
    %17 = arith.cmpi slt, %13, %16 : vector<1x128xi32>
    %18 = arith.andi %15, %17 : vector<1x128xi1>
    %cst_9 = arith.constant 0xFF800000 : f32
    %19 = vector.shape_cast %18 : vector<1x128xi1> to vector<1x128xi1>
    %20 = vector.broadcast %19 : vector<1x128xi1> to vector<8x128xi1>
    %21 = vector.broadcast %cst_9 : f32 to vector<8x128xf32>
    %22 = arith.select %20, %12, %21 : vector<8x128xi1>, vector<8x128xf32>
    %cst_10 = arith.constant dense<0xFF800000> : vector<8xf32>
    %23 = vector.multi_reduction <maximumf>, %22, %cst_10 [1] : vector<8x128xf32> to vector<8xf32>
    %24 = vector.shape_cast %23 : vector<8xf32> to vector<8x1xf32>
    %25 = vector.broadcast %24 : vector<8x1xf32> to vector<8x128xf32>
    %26 = arith.subf %22, %25 : vector<8x128xf32>
    %27 = math.exp %26 : vector<8x128xf32>
    %cst_11 = arith.constant dense<0.000000e+00> : vector<8xf32>
    %28 = vector.multi_reduction <add>, %27, %cst_11 [1] : vector<8x128xf32> to vector<8xf32>
    %29 = vector.shape_cast %28 : vector<8xf32> to vector<8x1xf32>
    %30 = vector.broadcast %29 : vector<8x1xf32> to vector<8x128xf32>
    %31 = arith.divf %27, %30 : vector<8x128xf32>
    %c0_i32 = arith.constant 0 : i32
    %32 = vector.broadcast %c0_i32 : i32 to vector<1x128xi32>
    %33 = arith.cmpi eq, %13, %32 : vector<1x128xi32>
    %34 = vector.shape_cast %33 : vector<1x128xi1> to vector<1x128xi1>
    %35 = vector.broadcast %34 : vector<1x128xi1> to vector<8x128xi1>
    %36 = arith.select %35, %12, %31 : vector<8x128xi1>, vector<8x128xf32>
    %37 = vector.extract_strided_slice %36 {offsets = [0, 0], sizes = [8, 8], strides = [1, 1]} : vector<8x128xf32> to vector<8x8xf32>
    %c0_12 = arith.constant 0 : index
    %c0_13 = arith.constant 0 : index
    %38 = vector.load %arg4[%c0_12, %c0_13] : memref<8x8xf32, #tpu.memory_space<vmem>>, vector<8x8xf32>
    tpu.vector_store %arg4[%c0_12, %c0_13], %37 {strides = array<i32>} : memref<8x8xf32, #tpu.memory_space<vmem>>, vector<8x8xf32>,
    return
  }
  func.func @transform_0(%arg0: i32) -> (i32, i32) {
    %c0_i32 = arith.constant 0 : i32
    %c0_i32_0 = arith.constant 0 : i32
    return %arg0, %c0_i32 : i32, i32
  }
  func.func @transform_1(%arg0: i32) -> (i32, i32) {
    %c0_i32 = arith.constant 0 : i32
    %c0_i32_0 = arith.constant 0 : i32
    %c0_i32_1 = arith.constant 0 : i32
    return %c0_i32, %c0_i32_0 : i32, i32
  }
  func.func @transform_2(%arg0: i32) -> (i32, i32) {
    %c0_i32 = arith.constant 0 : i32
    %c0_i32_0 = arith.constant 0 : i32
    %c0_i32_1 = arith.constant 0 : i32
    return %c0_i32, %c0_i32_0 : i32, i32
  }
  func.func @transform_3(%arg0: i32) -> (i32, i32) {
    %c0_i32 = arith.constant 0 : i32
    %c0_i32_0 = arith.constant 0 : i32
    return %arg0, %c0_i32 : i32, i32
  }
}

</mosaic_0001>

<bundles_post_ra>
// kernel: tpu_custom_call.1
= control target key start
LH: loop header
LB: loop body
LE: loop exit
PB: predicated region body
PF: predicated region fallthrough
CT: control target
= control target key end

     0   :  { %8 = vsyncpa [#allocation3], 0  ;;  %s470_s0 = inlined_call_operand.hbm [shape: f32[8,16], index: 0, kind: input, shape index: {}]   ;;  %s471_s1 = inlined_call_operand.hbm [shape: f32[24,128], index: 1, kind: input, shape index: {}]   ;;  %s472_s2 = inlined_call_operand.hbm [shape: f32[128,128], index: 2, kind: input, shape index: {}]   ;;  %s473_s3 = inlined_call_operand.hbm [shape: f32[8,8], index: 3, kind: output, shape index: {}]  }
   0x1   :  { %9 = vsyncpa [#allocation6], 0 }
   0x2   :  { %10 = vsyncpa [#allocation4], 0  ;;  %s430_s12 = smov [#allocation5]  }
   0x3   :  { %s26_s13 = sshll.u32 %s430_s12, 4  ;;  %s27_s13 = int_to_ptr.vmem [resolvable:$true] %s26_s13 }
   0x4   :  { %s352_s14 = scalar_lea.vmem %s27_s13, 384  ;;  %p357_p1 = scmp.lt.s32.totalorder %s27_s13, %s27_s13 }
   0x5   :  { %p353_p0 = scmp.ne.s32.totalorder %s27_s13, %s352_s14  ;;  %p358_p2 = scmp.lt.s32.totalorder %s352_s14, %s352_s14 }
   0x7   :  { %p359_p3 = por %p358_p2, %p357_p1 }
   0x9   :  { %p360_p4 = pnand %p359_p3, %p353_p0 }
   0xb   :  { %363 = shalt.err (!%p360_p4)
}
   0xc   :  { %s431_s15 = smov 128   ;;  %s432_s16 = smov 8  }
   0xd   :  { %32 = dma.hbm_to_vmem [thread:$0]  %s471_s1, 384, %s27_s13, [#allocation6], %s431_s15, %s431_s15, %s432_s16  }
   0xe   :  { %s433_s19 = smov [#allocation2]   ;;  %s434_s21 = smov [#allocation7]  }
   0xf   :  { %s17_s20 = sshll.u32 %s433_s19, 4  ;;  %s38_s22 = sshll.u32 %s434_s21, 4  ;;  %s18_s20 = int_to_ptr.vmem [resolvable:$true] %s17_s20  ;;  %s39_s22 = int_to_ptr.vmem [resolvable:$true] %s38_s22 }
  0x10   :  { %s372_s23 = scalar_lea.vmem %s18_s20, 128  ;;  %p377_p6 = scmp.lt.s32.totalorder %s18_s20, %s18_s20 }
  0x11   :  { %p373_p5 = scmp.ne.s32.totalorder %s18_s20, %s372_s23  ;;  %p378_p7 = scmp.lt.s32.totalorder %s372_s23, %s372_s23 }
  0x13   :  { %p379_p8 = por %p378_p7, %p377_p6 }
  0x15   :  { %p380_p9 = pnand %p379_p8, %p373_p5 }
  0x17   :  { %383 = shalt.err (!%p380_p9)
}
  0x18   :  { %20 = dma.hbm_to_vmem [thread:$0]  %s470_s0, 128, %s18_s20, [#allocation3]  }
  0x19   :  { %s392_s26 = scalar_lea.vmem %s39_s22, 2048  ;;  %p397_p11 = scmp.lt.s32.totalorder %s39_s22, %s39_s22 }
  0x1a   :  { %p393_p10 = scmp.ne.s32.totalorder %s39_s22, %s392_s26  ;;  %p398_p12 = scmp.lt.s32.totalorder %s392_s26, %s392_s26 }
  0x1c   :  { %p399_p13 = por %p398_p12, %p397_p11 }
  0x1e   :  { %p400_p0 = pnand %p399_p13, %p393_p10 }
  0x20   :  { %403 = shalt.err (!%p400_p0)
}
  0x21   :  { %44 = dma.hbm_to_vmem [thread:$0]  %s472_s2, 2048, %s39_s22, [#allocation6], %s431_s15, %s431_s15, %s432_s16  }
  0x22   :  { %424 = dma.done.wait [#allocation3], 128  }
  0x23   :  { %425 = vsyncadd [#allocation3], 4294967168 }
  0x24   :  { %426 = dma.done.wait [#allocation6], 2432  }
  0x25   :  { %427 = vsyncadd [#allocation6], 4294964864  ;;  %v435_v0 = vmov 0.0   ;;  %vm436_vm0 = vmmov 0   ;;  %v56_v1 = vld [vmem:[#allocation5 + $0x8] sm:$0xff]  ;;  %v55_v2 = vld [vmem:[#allocation5] sm:$0xff]  ;;  %v228_v25 = vlaneseq }
  0x26   :  { %290 = vmatprep.subr.mxu0 %v435_v0  ;;  %294 = vmatprep.mubr.msk.f32.mxu0 %vm436_vm0, %v435_v0  ;;  %v54_v3 = vld [vmem:[#allocation2] sm:$0xff]  ;;  %vm63_vm1 = vcmask 130048   ;;  %v153_v4 = vld [vmem:[#allocation7 + $0x78] sm:$0xff]  ;;  %v152_v5 = vld [vmem:[#allocation7 + $0x70] sm:$0xff]  ;;  %s437_s0 = smov [#allocation8]   ;;  %vm249_vm6 = vcmask 64512  }
  0x27   :  { %297 = vmatprep.subr.mxu1 %v435_v0  ;;  %329 = vmatprep.mubr.msk.f32.mxu1 %vm436_vm0, %v435_v0  ;;  %v151_v6 = vld [vmem:[#allocation7 + $0x68] sm:$0xff]  ;;  %v150_v7 = vld [vmem:[#allocation7 + $0x60] sm:$0xff]  ;;  %v149_v8 = vld [vmem:[#allocation7 + $0x58] sm:$0xff]  ;;  %v229_v26 = vand.u32 127, %v228_v25  ;;  %s257_s2 = sshll.u32 %s437_s0, 4  ;;  %s258_s2 = int_to_ptr.vmem [resolvable:$true] %s257_s2 }
  0x28   :  { %291 = vmatpush3.msra.mxu0 %v56_v1  ;;  %298 = vmatpush3.msra.mxu1 %v153_v4  ;;  %v148_v9 = vld [vmem:[#allocation7 + $0x50] sm:$0xff]  ;;  %v147_v10 = vld [vmem:[#allocation7 + $0x48] sm:$0xff]  ;;  %v146_v11 = vld [vmem:[#allocation7 + $0x40] sm:$0xff]  ;;  %s404_s28 = scalar_lea.vmem %s258_s2, 128  ;;  %p409_p2 = scmp.lt.s32.totalorder %s258_s2, %s258_s2 }
  0x29   :  { %292 = vmatprep.subr.mxu0 %v435_v0  ;;  %299 = vmatprep.subr.mxu1 %v435_v0  ;;  %v145_v12 = vld [vmem:[#allocation7 + $0x38] sm:$0xff]  ;;  %v144_v13 = vld [vmem:[#allocation7 + $0x30] sm:$0xff]  ;;  %v143_v14 = vld [vmem:[#allocation7 + $0x28] sm:$0xff]  ;;  %vm230_vm2 = vcmp.ge.s32.totalorder %v229_v26, 1  ;;  %vm231_vm3 = vcmp.lt.s32.totalorder %v229_v26, 5  ;;  %vm245_vm5 = vcmp.eq.s32.totalorder %v229_v26, 0  ;;  %p405_p1 = scmp.ne.s32.totalorder %s258_s2, %s404_s28  ;;  %p410_p3 = scmp.lt.s32.totalorder %s404_s28, %s404_s28 }
  0x2a   :  { %293 = vmatpush3.msra.mxu0 %v55_v2  ;;  %300 = vmatpush3.msra.mxu1 %v152_v5  ;;  %v142_v15 = vld [vmem:[#allocation7 + $0x20] sm:$0xff]  ;;  %v141_v16 = vld [vmem:[#allocation7 + $0x18] sm:$0xff]  ;;  %v140_v17 = vld [vmem:[#allocation7 + $0x10] sm:$0xff] }
  0x2b   :  { %295 = vmatmul.mubr.msk.f32.vlgmr.msra.gmra.mxu0 %vm63_vm1, %v54_v3  ;;  %301 = vmatprep.subr.mxu1 %v435_v0  ;;  %v139_v18 = vld [vmem:[#allocation7 + $0x8] sm:$0xff]  ;;  %v138_v19 = vld [vmem:[#allocation7] sm:$0xff]  ;;  %v267_v20 = vld [vmem:[#allocation5 + $0x10] ss:$0 sm:$0xff]  ;;  %p411_p4 = por %p410_p3, %p409_p2 }
  0x2c   :  { %302 = vmatpush3.msra.mxu1 %v151_v6  ;;  %v269_v27 = vld [vmem:[#allocation5 + $0x11] ss:$0 sm:$0xff]  ;;  %vm232_vm4 = vmand %vm230_vm2, %vm231_vm3 }
  0x2d   :  { %303 = vmatprep.subr.mxu1 %v435_v0  ;;  %p412_p5 = pnand %p411_p4, %p405_p1 }
  0x2e   :  { %304 = vmatpush3.msra.mxu1 %v150_v7 }
  0x2f   :  { %305 = vmatprep.subr.mxu1 %v435_v0 }
  0x30   :  { %306 = vmatpush3.msra.mxu1 %v149_v8 }
  0x31   :  { %307 = vmatprep.subr.mxu1 %v435_v0 }
  0x32   :  { %308 = vmatpush3.msra.mxu1 %v148_v9 }
  0x33   :  { %309 = vmatprep.subr.mxu1 %v435_v0 }
  0x34   :  { %310 = vmatpush3.msra.mxu1 %v147_v10 }
  0x35   :  { %311 = vmatprep.subr.mxu1 %v435_v0 }
  0x36   :  { %312 = vmatpush3.msra.mxu1 %v146_v11 }
  0x37   :  { %313 = vmatprep.subr.mxu1 %v435_v0 }
  0x38   :  { %314 = vmatpush3.msra.mxu1 %v145_v12 }
  0x39   :  { %315 = vmatprep.subr.mxu1 %v435_v0 }
  0x3a   :  { %316 = vmatpush3.msra.mxu1 %v144_v13 }
  0x3b   :  { %317 = vmatprep.subr.mxu1 %v435_v0 }
  0x3c   :  { %318 = vmatpush3.msra.mxu1 %v143_v14 }
  0x3d   :  { %319 = vmatprep.subr.mxu1 %v435_v0 }
  0x3e   :  { %320 = vmatpush3.msra.mxu1 %v142_v15 }
  0x3f   :  { %321 = vmatprep.subr.mxu1 %v435_v0 }
  0x40   :  { %322 = vmatpush3.msra.mxu1 %v141_v16 }
  0x41   :  { %323 = vmatprep.subr.mxu1 %v435_v0 }
  0x42   :  { %324 = vmatpush3.msra.mxu1 %v140_v17 }
  0x43   :  { %325 = vmatprep.subr.mxu1 %v435_v0 }
  0x44   :  { %326 = vmatpush3.msra.mxu1 %v139_v18 }
  0x45   :  { %327 = vmatprep.subr.mxu1 %v435_v0 }
  0x46   :  { %328 = vmatpush3.msra.mxu1 %v138_v19 }
  0xeb   :  { %v133_v21 = vpop.f32.mrf.mxu0 }
  0xec   :  { %v134_v22 = vadd.f32 %v267_v20, %v133_v21 }
  0xed   :  { %v296_v23 = vpop.f32.mrf.mxu0 }
  0xee   :  { %v137_v24 = vmax.f32 %v134_v22, 0.0 }
  0xf0   :  { %330 = vmatmul.mubr.f32.vlgmr.msra.gmra.mxu1 %v137_v24 }
 0x1b0   :  { %v224_v28 = vpop.f32.mrf.mxu1 }
 0x1b1   :  { %v225_v29 = vadd.f32 %v269_v27, %v224_v28 }
 0x1b2   :  { %v331_v30 = vpop.f32.mrf.mxu1 }
 0x1b3   :  { %v235_v31 = vsel %vm232_vm4, %v225_v29, -inf }
 0x1b4   :  { %236 = vmax.xlane.f32.xlu0 %v235_v31 }
 0x23d   :  { %v237_v32 = vpop.xlane.xlu0 %236 }
 0x23e   :  { %v238_v33 = vsub.f32 %v235_v31, %v237_v32 }
 0x240   :  { %v239_v34 = vmul.f32 1.442695, %v238_v33 }
 0x242   :  { %340 = vpow2.f32 %v239_v34 }
 0x24f   :  { %v341_v35 = vpop.eup %340 }
 0x250   :  { %241 = vadd.xlane.f32.xlu0 %v341_v35 }
 0x2d9   :  { %v242_v36 = vpop.xlane.xlu0 %241 }
 0x2da   :  { %342 = vrcp.f32 %v242_v36 }
 0x2e7   :  { %v343_v37 = vpop.eup %342 }
 0x2e8   :  { %v244_v38 = vmul.f32 %v343_v37, %v341_v35 }
 0x2ea   :  { %v248_v39 = vsel %vm245_vm5, %v225_v29, %v244_v38 }
 0x2eb   :  { %250 = vst.msk [vmem:[#allocation8] sm:$0xff] %vm249_vm6, %v248_v39 }
 0x2ec   :  { %415 = shalt.err (!%p412_p5)
}
 0x2ed   :  { %260 = dma.vmem_to_hbm [thread:$0]  %s258_s2, 128, %s473_s3, [#allocation4]  }
 0x2ee   :  { %428 = dma.done.wait [#allocation4], 128  }
 0x2ef   :  { %429 = vsyncadd [#allocation4], 4294967168 }
 0x2f0   :  { %264 = vsyncpa [#allocation3], 1 }
 0x2f1   :  { %265 = vsyncpa [#allocation6], 1 }
 0x2f2   :  { %266 = vsyncpa [#allocation4], 1 }

</bundles_post_ra>
